<compile_context>
chip_gen: v6e
topology: v6e:2x2x1
jax: 0.10.0
libtpu: 0.0.40
codegen_flags: <defaults>
</compile_context>

<pallas_src>
import jax
import jax.numpy as jnp
from jax.experimental import pallas as pl
from jax.experimental.pallas import tpu as pltpu


def _graph_bias_kernel(gt_ref, gti_ref, edge_ref, etab_ref, sel_ref, out_ref):
    """Writes one (H, TILE_M) lane-dense slab of the flat-pair bias plane.

    gt_ref  : (H, N)           f32  node embeddings (head-major) of this batch elem
    gti_ref : (H, TILE_I)      f32  node embeddings of the i-rows covered by this tile
    edge_ref: (1, TILE_M)      i32  edge types, flat pair index m = ti*N + j
    etab_ref: (H, E+1)         f32  transposed edge embedding table
    sel_ref : (TILE_I, TILE_M) f32  constant row selector: sel[t, m] = (m // N == t)
    out_ref : (H, TILE_M)      f32  bias[h, m] = g[i, h] * g[j, h] + etab[edge[m], h]
    """
    f32 = jnp.float32
    e1 = etab_ref.shape[1]
    h, tile_m = out_ref.shape
    tile_i = gti_ref.shape[1]

    # --- edge embedding gather: one one-hot shared across all H heads, 1 MXU op ---
    # TODO(synk): out-of-range edge ids gather zeros here; nn.Embedding would raise.
    oh_e = (edge_ref[...] ==
            jax.lax.broadcasted_iota(jnp.int32, (e1, tile_m), 0)).astype(f32)   # (E+1, TILE_M)
    bias = jnp.dot(etab_ref[...], oh_e, preferred_element_type=f32)             # (H, TILE_M)

    # --- graph outer-product term for this row tile ---
    # g_i[h, m] = gTi[h, m // N] via the precomputed constant selector matmul
    # (no per-step iota / integer-divide / compare work on the VPU).
    g_i = jnp.dot(gti_ref[...], sel_ref[...], preferred_element_type=f32)       # (H, TILE_M)
    # g_j[h, m] = gT[h, m % N] is a lane tiling of the per-batch embeddings.
    g_j = jnp.tile(gt_ref[...], (1, tile_i))                                    # (H, TILE_M)

    out_ref[...] = g_i * g_j + bias


def _choose_tile_i(n, h, e1, *, max_lanes=32768, vmem_budget=24 * 1024 * 1024):
    """Pick TILE_I (rows of the pair plane per grid step) so TILE_M = TILE_I*N is large
    (HBM-writeback bound, not launch-overhead bound) while the per-step VMEM footprint
    stays safe on all of v5e / v6e / v7x, preferring 128-aligned lane widths."""
    def est_bytes(d):
        tile_m = d * n
        # out double-buffer + edge-id double-buffer + resident selector (2 bufs)
        # + edge one-hot temp + g_i/g_j/bias temps, all f32/i32.
        return tile_m * 4 * (2 * h + 2 + 2 * d + e1 + 3 * h)

    divs = [d for d in range(1, n + 1) if n % d == 0]
    feasible = [d for d in divs if d * n <= max_lanes and est_bytes(d) <= vmem_budget]
    if not feasible:
        return 1
    # Prefer an unmasked-vst lane width: TILE_M multiple of 128, or the full flat
    # dim (block == full array dim is always legal).
    aligned = [d for d in feasible if (d * n) % 128 == 0 or d == n]
    # TODO(synk): when N has no divisor giving a 128-multiple TILE_M and the full
    # plane is too big, we fall back to a masked-store tile width (correct, slower).
    return max(aligned) if aligned else max(feasible)


def graph_encoding_bias(node_index, edge_types, graph_table, edge_table, *, tile_i=None):
    """node_index: (B, N) int, edge_types: (B, N, N) int.

    graph_table: (num_nodes, H), edge_table: (num_edges + 1, H).
    Returns (B, H, N, N) float32, matching GraphEncodingBias.forward.
    """
    b, n = node_index.shape
    v, h = graph_table.shape
    e1 = edge_table.shape[0]
    m = n * n

    if tile_i is None:
        tile_i = _choose_tile_i(n, h, e1)
    assert n % tile_i == 0, "tile_i must divide N"
    tile_m = tile_i * n
    n_tiles = n // tile_i

    f32 = jnp.float32

    # Hoisted node-embedding gather (it only depends on the batch index, not on the
    # pair-tile grid axis): a tiny (B*N*H) XLA gather instead of a (V, N) one-hot +
    # matmul redone every grid step; the (H, V) table never enters VMEM.
    # TODO(synk): XLA clamps out-of-range node ids instead of raising like nn.Embedding.
    g = graph_table.astype(f32)[node_index]                                   # (B, N, H)
    gt = jnp.transpose(g, (0, 2, 1))                                          # (B, H, N)
    gti = jnp.transpose(g.reshape(b, n_tiles, tile_i, h), (0, 1, 3, 2))       # (B, T, H, TILE_I)

    edge_in = edge_types.reshape(b, 1, m).astype(jnp.int32)                   # flat pair index
    etab_t = edge_table.astype(f32).T                                         # (H, E+1)

    # Compile-time-constant row selector: sel[t, m] = (m // N == t), built once.
    sel = (jnp.arange(tile_m, dtype=jnp.int32)[None, :] // n ==
           jnp.arange(tile_i, dtype=jnp.int32)[:, None]).astype(f32)          # (TILE_I, TILE_M)

    cost = pl.CostEstimate(
        flops=int(2 * b * m * h * (e1 + tile_i) + 3 * b * h * m),
        transcendentals=0,
        bytes_accessed=int(b * h * m * 4 + b * m * 4 + 2 * b * h * n * 4
                           + h * e1 * 4 + tile_i * tile_m * 4),
    )

    out_flat = pl.pallas_call(
        _graph_bias_kernel,
        out_shape=jax.ShapeDtypeStruct((b, h, m), f32),
        grid=(b, n_tiles),
        in_specs=[
            pl.BlockSpec((None, h, n), lambda bi, ti: (bi, 0, 0)),               # gT (per batch)
            pl.BlockSpec((None, None, h, tile_i), lambda bi, ti: (bi, ti, 0, 0)),  # gT i-tile
            pl.BlockSpec((None, 1, tile_m), lambda bi, ti: (bi, 0, ti)),         # edge-type tile
            pl.BlockSpec((h, e1), lambda bi, ti: (0, 0)),                        # edge table^T
            pl.BlockSpec((tile_i, tile_m), lambda bi, ti: (0, 0)),               # row selector
        ],
        out_specs=pl.BlockSpec((None, h, tile_m), lambda bi, ti: (bi, 0, ti)),
        compiler_params=pltpu.CompilerParams(
            dimension_semantics=("parallel", "parallel"),
            vmem_limit_bytes=48 * 1024 * 1024,
        ),
        cost_estimate=cost,
    )(gt, gti, edge_in, etab_t, sel)

    # (B, H, N*N) -> (B, H, N, N): contiguous, metadata-only reshape (no transpose).
    return out_flat.reshape(b, h, n, n)


if __name__ == "__main__":
    key = jax.random.PRNGKey(0)
    k1, k2, k3, k4 = jax.random.split(key, 4)

    # small, forward-consistent hyper-params
    num_nodes = 16      # node vocab size
    num_edges = 4       # edge table has num_edges + 1 rows
    num_head = 4        # TODO(synk): H < 8 under-fills sublanes; pad H to 8 if perf-critical.
    batch = 2
    n = 8               # nodes per graph

    # nn.Embedding weights after self.apply(init_params): normal(0, 0.02).
    graph_table = 0.02 * jax.random.normal(k1, (num_nodes, num_head), dtype=jnp.float32)
    edge_table = 0.02 * jax.random.normal(k2, (num_edges + 1, num_head), dtype=jnp.float32)

    node_index = jax.random.randint(k3, (batch, n), 0, num_nodes, dtype=jnp.int32)
    edge_types = jax.random.randint(k4, (batch, n, n), 0, num_edges + 1, dtype=jnp.int32)

    out = jax.block_until_ready(
        jax.jit(graph_encoding_bias)(node_index, edge_types, graph_table, edge_table))

    # pure-JAX reference of the PyTorch forward
    g = graph_table[node_index]                       # (B, N, H)
    gb = g[:, :, None, :] * g[:, None, :, :]          # (B, N, N, H)
    eb = edge_table[edge_types]                       # (B, N, N, H)
    ref = jnp.transpose(gb + eb, (0, 3, 1, 2))        # (B, H, N, N)

    assert out.shape == (batch, num_head, n, n), out.shape
    assert jnp.allclose(out, ref, atol=1e-5, rtol=1e-5), "mismatch vs reference"
    print("KERNEL_OK")
</pallas_src>

<mosaic_0001>
module attributes {stable_mosaic.version = 11 : i64} {
  func.func @_graph_bias_kernel(%arg0: i32, %arg1: i32, %arg2: memref<1x4x8xf32, #tpu.memory_space<vmem>>, %arg3: memref<1x1x4x8xf32, #tpu.memory_space<vmem>>, %arg4: memref<1x1x64xi32, #tpu.memory_space<vmem>>, %arg5: memref<4x5xf32, #tpu.memory_space<vmem>>, %arg6: memref<8x64xf32, #tpu.memory_space<vmem>>, %arg7: memref<1x4x64xf32, #tpu.memory_space<vmem>>) attributes {dimension_semantics = [#tpu.dimension_semantics<parallel>, #tpu.dimension_semantics<parallel>], iteration_bounds = array<i64: 2, 1>, scalar_prefetch = 0 : i64, scratch_operands = 0 : i64, tpu.core_type = #tpu.core_type<tc>, window_params = [{transform_indices = @transform_0, window_bounds = array<i64: 1, 4, 8>}, {transform_indices = @transform_1, window_bounds = array<i64: 1, 1, 4, 8>}, {transform_indices = @transform_2, window_bounds = array<i64: 1, 1, 64>}, {pipeline_mode = #tpu.pipeline_mode<synchronous>, transform_indices = @transform_3, window_bounds = array<i64: 4, 5>}, {pipeline_mode = #tpu.pipeline_mode<synchronous>, transform_indices = @transform_4, window_bounds = array<i64: 8, 64>}, {transform_indices = @transform_5, window_bounds = array<i64: 1, 4, 64>}]} {
    %c0 = arith.constant 0 : index
    %c0_0 = arith.constant 0 : index
    %c0_1 = arith.constant 0 : index
    %0 = vector.load %arg4[%c0, %c0_0, %c0_1] : memref<1x1x64xi32, #tpu.memory_space<vmem>>, vector<1x1x64xi32>
    %1 = vector.shape_cast %0 : vector<1x1x64xi32> to vector<1x64xi32>
    %2 = tpu.iota {dimensions = array<i32: 0>} : vector<5x64xi32>
    %3 = vector.broadcast %1 : vector<1x64xi32> to vector<5x64xi32>
    %4 = arith.cmpi eq, %3, %2 : vector<5x64xi32>
    %5 = arith.extui %4 : vector<5x64xi1> to vector<5x64xi32>
    %6 = arith.sitofp %5 : vector<5x64xi32> to vector<5x64xf32>
    %c0_2 = arith.constant 0 : index
    %c0_3 = arith.constant 0 : index
    %7 = vector.load %arg5[%c0_2, %c0_3] : memref<4x5xf32, #tpu.memory_space<vmem>>, vector<4x5xf32>
    %cst = arith.constant dense<0.000000e+00> : vector<4x64xf32>
    %8 = tpu.matmul %7, %6, %cst {dimension_numbers = #tpu.dot_dimension_numbers<[1], [0], [0], [1], [0, 0, 1, 1], [], []>} : vector<4x5xf32>, vector<5x64xf32>, vector<4x64xf32> -> vector<4x64xf32>
    %c0_4 = arith.constant 0 : index
    %c0_5 = arith.constant 0 : index
    %c0_6 = arith.constant 0 : index
    %c0_7 = arith.constant 0 : index
    %9 = vector.load %arg3[%c0_4, %c0_5, %c0_6, %c0_7] : memref<1x1x4x8xf32, #tpu.memory_space<vmem>>, vector<1x1x4x8xf32>
    %10 = vector.shape_cast %9 : vector<1x1x4x8xf32> to vector<4x8xf32>
    %c0_8 = arith.constant 0 : index
    %c0_9 = arith.constant 0 : index
    %11 = vector.load %arg6[%c0_8, %c0_9] : memref<8x64xf32, #tpu.memory_space<vmem>>, vector<8x64xf32>
    %cst_10 = arith.constant dense<0.000000e+00> : vector<4x64xf32>
    %12 = tpu.matmul %10, %11, %cst_10 {dimension_numbers = #tpu.dot_dimension_numbers<[1], [0], [0], [1], [0, 0, 1, 1], [], []>} : vector<4x8xf32>, vector<8x64xf32>, vector<4x64xf32> -> vector<4x64xf32>
    %c0_11 = arith.constant 0 : index
    %c0_12 = arith.constant 0 : index
    %c0_13 = arith.constant 0 : index
    %13 = vector.load %arg2[%c0_11, %c0_12, %c0_13] : memref<1x4x8xf32, #tpu.memory_space<vmem>>, vector<1x4x8xf32>
    %14 = vector.shape_cast %13 : vector<1x4x8xf32> to vector<4x8xf32>
    %15 = tpu.concatenate %14, %14, %14, %14, %14, %14, %14, %14 in 1 : vector<4x8xf32>, vector<4x8xf32>, vector<4x8xf32>, vector<4x8xf32>, vector<4x8xf32>, vector<4x8xf32>, vector<4x8xf32>, vector<4x8xf32> -> vector<4x64xf32>
    %16 = arith.mulf %12, %15 : vector<4x64xf32>
    %17 = arith.addf %16, %8 : vector<4x64xf32>
    %c0_14 = arith.constant 0 : index
    %c0_15 = arith.constant 0 : index
    %c0_16 = arith.constant 0 : index
    %18 = vector.load %arg7[%c0_14, %c0_15, %c0_16] : memref<1x4x64xf32, #tpu.memory_space<vmem>>, vector<1x4x64xf32>
    %19 = vector.shape_cast %18 : vector<1x4x64xf32> to vector<4x64xf32>
    %20 = vector.shape_cast %17 : vector<4x64xf32> to vector<1x4x64xf32>
    tpu.vector_store %arg7[%c0_14, %c0_15, %c0_16], %20 {strides = array<i32>} : memref<1x4x64xf32, #tpu.memory_space<vmem>>, vector<1x4x64xf32>,
    return
  }
  func.func @transform_0(%arg0: i32, %arg1: i32) -> (i32, i32, i32) {
    %c0_i32 = arith.constant 0 : i32
    %c0_i32_0 = arith.constant 0 : i32
    %c0_i32_1 = arith.constant 0 : i32
    return %arg0, %c0_i32, %c0_i32_0 : i32, i32, i32
  }
  func.func @transform_1(%arg0: i32, %arg1: i32) -> (i32, i32, i32, i32) {
    %c0_i32 = arith.constant 0 : i32
    %c0_i32_0 = arith.constant 0 : i32
    %c0_i32_1 = arith.constant 0 : i32
    return %arg0, %arg1, %c0_i32, %c0_i32_0 : i32, i32, i32, i32
  }
  func.func @transform_2(%arg0: i32, %arg1: i32) -> (i32, i32, i32) {
    %c0_i32 = arith.constant 0 : i32
    %c0_i32_0 = arith.constant 0 : i32
    return %arg0, %c0_i32, %arg1 : i32, i32, i32
  }
  func.func @transform_3(%arg0: i32, %arg1: i32) -> (i32, i32) {
    %c0_i32 = arith.constant 0 : i32
    %c0_i32_0 = arith.constant 0 : i32
    %c0_i32_1 = arith.constant 0 : i32
    return %c0_i32, %c0_i32_0 : i32, i32
  }
  func.func @transform_4(%arg0: i32, %arg1: i32) -> (i32, i32) {
    %c0_i32 = arith.constant 0 : i32
    %c0_i32_0 = arith.constant 0 : i32
    %c0_i32_1 = arith.constant 0 : i32
    return %c0_i32, %c0_i32_0 : i32, i32
  }
  func.func @transform_5(%arg0: i32, %arg1: i32) -> (i32, i32, i32) {
    %c0_i32 = arith.constant 0 : i32
    %c0_i32_0 = arith.constant 0 : i32
    return %arg0, %c0_i32, %arg1 : i32, i32, i32
  }
}

</mosaic_0001>

<bundles_post_ra>
// kernel: graph_encoding_bias.1
= control target key start
LH: loop header
LB: loop body
LE: loop exit
PB: predicated region body
PF: predicated region fallthrough
CT: control target
= control target key end

     0   :  { %s721_s18 = smov 0   ;;  %s723_s19 = smov 0   ;;  %s773_s0 = inlined_call_operand.vmem [shape: f32[2,4,8], index: 0, kind: input, shape index: {}]   ;;  %s774_s1 = inlined_call_operand.vmem [shape: f32[2,1,4,8], index: 1, kind: input, shape index: {}]   ;;  %s775_s2 = inlined_call_operand.vmem [shape: s32[2,1,64], index: 2, kind: input, shape index: {}]   ;;  %s776_s3 = inlined_call_operand.vmem [shape: f32[4,5], index: 3, kind: input, shape index: {}]   ;;  %s777_s4 = inlined_call_operand.vmem [shape: f32[8,64], index: 4, kind: input, shape index: {}]   ;;  %s778_s5 = inlined_call_operand.vmem [shape: f32[2,4,64], index: 5, kind: output, shape index: {}]  }
   0x1   :  { %s725_s20 = smov 0  }
   0x2 LB: > { %s27_s21 = sadd.s32 1, %s676_s19  ;;  %p600_p0 = scmp.ge.s32.totalorder %s680_s20, 1  ;;  %s680_s20 = sphi %s725_s20, %s15_s20   ;;  %s676_s19 = sphi %s723_s19, %s780_s19   ;;  %s672_s18 = sphi %s721_s18, %s779_s18  }
   0x3   : > { %p29_p1 = scmp.ge.s32.totalorder %s27_s21, 2  ;;  %p227_p2 = scmp.lt.s32.totalorder %s680_s20, 3 }
   0x5   : > { %s782_s21 = smov (%p29_p1, %s27_s21), 0  ;;  %p228_p3 = pnand %p600_p0, %p227_p2 }
   0x6   : > { %p269_p4 = scmp.lt.s32.totalorder (!%p228_p3), %s672_s18, 1  ;;  %s684_s11 = smov (!%p228_p3), 8  }
   0x7   : > { %231 = sbr.rel (%p228_p3) target bundleno = 215 (0xd7), region = 40  ;;  %s685_s12 = smov (!%p228_p3), 24  }
   0x8   : > { %s686_s13 = smov (!%p228_p3), 16   ;;  %s687_s14 = smov (!%p228_p3), 32  }
   0x9   : > { %s688_s15 = smov (!%p228_p3), 40   ;;  %s689_s16 = smov (!%p228_p3), 48  }
   0xa   : > { %s690_s17 = smov (!%p228_p3), 56  }
   0xc   : > { %v383_v0 = vld [vmem:[%s777_s4] sm:$0xff]  ;;  %v294_v1 = vlaneseq  ;;  %v682_v2 = vmov 0.0   ;;  %vm683_vm0 = vmmov 0   ;;  %s784_s18 = smov (!%p269_p4, %s672_s18), 1  ;;  %vm384_vm1 = vcmask 64512  }
   0xd   : > { %620 = vmatprep.subr.mxu1 %v682_v2  ;;  %622 = vmatprep.mubr.msk.f32.mxu1 %vm683_vm0, %v682_v2  ;;  %s742_s24 = sshll.u32 %s784_s18, 2  ;;  %s285_s27 = scalar_lea.vmem %s775_s2, %s784_s18  ;;  %vm308_vm2 = vcmask 1044480   ;;  %v303_v5 = vld [vmem:[%s776_s3] sm:$0xf]  ;;  %vm304_vm4 = vcmask 39936   ;;  %vm482_vm5 = vcmask 130048  }
   0xe   : > { %621 = vmatpush3.msra.mxu1 %v383_v0  ;;  %615 = vmatprep.subr.mxu0 %v682_v2  ;;  %v295_v3 = vshrl.u32 %v294_v1, 7  ;;  %s272_s30 = scalar_lea.vmem %s773_s0, %s742_s24  ;;  %s279_s8 = scalar_lea.vmem %s774_s1, %s742_s24  ;;  %v604_v4 = vld [vmem:[%s285_s27] ss:$0 sm:$0xff]  ;;  %vm484_vm6 = vcmask 195584   ;;  %vm486_vm7 = vcmask 261120   ;;  %vm488_vm8 = vcmask 326656  }
   0xf   : > { %617 = vmatprep.mubr.msk.f32.mxu0 %vm683_vm0, %v682_v2  ;;  %v382_v6 = vld [vmem:[%s279_s8] sm:$0xf]  ;;  %vm490_vm9 = vcmask 392192   ;;  %vm492_vm10 = vcmask 457728   ;;  %s292_s23 = scalar_lea.vmem %s778_s5, %s742_s24  ;;  %vm496_vm11 = vcmask 519168  }
  0x10   : > { %v458_v7 = vld [vmem:[%s272_s30] sm:$0xf]  ;;  %vm300_vm3 = vcmp.eq.s32.totalorder %v604_v4, %v295_v3  ;;  %623 = vmatmul.mubr.msk.f32.vlgmr.msra.gmra.mxu1 %vm384_vm1, %v382_v6 }
  0x11   : > { %v605_v8 = vsel %vm300_vm3, 1.0, %v682_v2  ;;  %460 = vrot.lane.b32.xlu0 %v458_v7, %s684_s11  ;;  %466 = vrot.lane.b32.xlu1 %v458_v7, %s685_s12 }
  0x12   : > { %616 = vmatpush3.msk.msra.mxu0 %vm308_vm2, %v605_v8 }
  0x13   : > { %618 = vmatmul.mubr.msk.f32.vlgmr.msra.gmra.mxu0 %vm304_vm4, %v303_v5 }
  0x15   : > { %463 = vrot.lane.b32.xlu0 %v458_v7, %s686_s13  ;;  %469 = vrot.lane.b32.xlu1 %v458_v7, %s687_s14 }
  0x19   : > { %472 = vrot.lane.b32.xlu0 %v458_v7, %s688_s15  ;;  %475 = vrot.lane.b32.xlu1 %v458_v7, %s689_s16 }
  0x1d   : > { %478 = vrot.lane.b32.xlu0 %v458_v7, %s690_s17 }
  0x83   : > { %v461_v9 = vpop.permute.xlu0 %460  ;;  %v467_v11 = vpop.permute.xlu1 %466 }
  0x84   : > { %v481_v10 = vsel %vm384_vm1, %v458_v7, %v461_v9 }
  0x87   : > { %v464_v12 = vpop.permute.xlu0 %463  ;;  %v470_v14 = vpop.permute.xlu1 %469 }
  0x88   : > { %v483_v13 = vsel %vm482_vm5, %v481_v10, %v464_v12 }
  0x89   : > { %v485_v15 = vsel %vm484_vm6, %v483_v13, %v467_v11 }
  0x8a   : > { %v487_v16 = vsel %vm486_vm7, %v485_v15, %v470_v14 }
  0x8b   : > { %v473_v17 = vpop.permute.xlu0 %472  ;;  %v476_v19 = vpop.permute.xlu1 %475 }
  0x8c   : > { %v489_v18 = vsel %vm488_vm8, %v487_v16, %v473_v17 }
  0x8d   : > { %v491_v20 = vsel %vm490_vm9, %v489_v18, %v476_v19 }
  0x8f   : > { %v479_v21 = vpop.permute.xlu0 %478 }
  0x90   : > { %v493_v23 = vsel %vm492_vm10, %v491_v20, %v479_v21 }
  0xd0   : > { %v454_v22 = vpop.f32.mrf.mxu1 }
  0xd1   : > { %v494_v24 = vmul.f32 %v493_v23, %v454_v22 }
  0xd2   : > { %v624_v26 = vpop.f32.mrf.mxu1 }
  0xd3   : > { %v378_v25 = vpop.f32.mrf.mxu0 }
  0xd4   : > { %v495_v27 = vadd.f32 %v494_v24, %v378_v25 }
  0xd5   : > { %v619_v28 = vpop.f32.mrf.mxu0 }
  0xd6   : > { %497 = vst.msk [vmem:[%s292_s23] sm:$0xf] %vm496_vm11, %v495_v27 }
  0xd7 PF: > { %s15_s20 = sadd.s32 1, %s680_s20   ;;  %s779_s18 = smov %s676_s19 }
  0xd8   : > { %p12_p5 = scmp.ge.s32.totalorder %s15_s20, 4   ;;  %s780_s19 = smov %s782_s21 }
  0xda   :  { %14 = sbr.rel (!%p12_p5) target bundleno = 2 (0x2), region = 76 }

</bundles_post_ra>
